<compile_context>
chip_gen: v6e
topology: v6e:2x2x1
jax: 0.10.0
libtpu: 0.0.40
codegen_flags: <defaults>
</compile_context>

<pallas_src>
import jax
import jax.numpy as jnp
from jax.experimental import pallas as pl
from jax.experimental.pallas import tpu as pltpu


# ---------------------------------------------------------------------------
# Forward of the abstract base Model: a pure pass-through.
# ---------------------------------------------------------------------------
def model_forward(x_nchw: jax.Array) -> jax.Array:
    """Identity forward — metadata-level, zero HBM traffic."""
    return x_nchw


# ---------------------------------------------------------------------------
# Materializing identity: direct HBM->HBM DMA copy (no VMEM round-trip).
# ---------------------------------------------------------------------------
_SMALL_BYTES = 256 << 10        # below this, a kernel launch is pure overhead
_CHUNK_TARGET_BYTES = 8 << 20   # aim for ~8 MiB per in-flight DMA
_MAX_CHUNKS = 4                 # cap on concurrent DMAs


def _chunk_bounds(n_rows: int, total_bytes: int):
    """Static leading-axis chunk boundaries for up to _MAX_CHUNKS DMAs."""
    if n_rows <= 1 or total_bytes < 2 * _CHUNK_TARGET_BYTES:
        return (0, n_rows)
    n_chunks = int(min(_MAX_CHUNKS,
                       max(1, total_bytes // _CHUNK_TARGET_BYTES),
                       n_rows))
    base, rem = divmod(n_rows, n_chunks)
    bounds = [0]
    for c in range(n_chunks):
        bounds.append(bounds[-1] + base + (1 if c < rem else 0))
    return tuple(bounds)


def _make_dma_identity_kernel(bounds):
    n_chunks = len(bounds) - 1

    def kernel(x_hbm, o_hbm, sems):
        if n_chunks == 1:
            cp = pltpu.make_async_copy(x_hbm, o_hbm, sems.at[0])
            cp.start()
            cp.wait()
            return
        # Issue all DMAs first (concurrent engines), then wait on all.
        copies = []
        for c in range(n_chunks):
            lo, hi = bounds[c], bounds[c + 1]   # static slices -> free views
            cp = pltpu.make_async_copy(x_hbm.at[lo:hi], o_hbm.at[lo:hi],
                                       sems.at[c])
            cp.start()
            copies.append(cp)
        for cp in copies:
            cp.wait()

    return kernel


def identity_materialize(x: jax.Array, *, force_kernel: bool = False) -> jax.Array:
    """Materializing identity. Large arrays: direct HBM->HBM DMA inside a
    Pallas kernel (no VMEM, no per-step pipeline overhead). Small arrays:
    plain jnp copy unless `force_kernel`."""
    if x.size == 0:
        return x
    if not force_kernel and x.nbytes < _SMALL_BYTES:
        return jnp.copy(x)

    n_rows = x.shape[0] if x.ndim >= 1 else 1
    bounds = _chunk_bounds(n_rows, x.nbytes)
    n_chunks = len(bounds) - 1

    return pl.pallas_call(
        _make_dma_identity_kernel(bounds),
        out_shape=jax.ShapeDtypeStruct(x.shape, x.dtype),
        in_specs=[pl.BlockSpec(memory_space=pl.ANY)],
        out_specs=pl.BlockSpec(memory_space=pl.ANY),
        scratch_shapes=[pltpu.SemaphoreType.DMA((n_chunks,))],
    )(x)


# ---------------------------------------------------------------------------
# AverageMonitor — running weighted average of K updates (plain JAX).
#   sum = sum(val_k * n_k); count = sum(n_k); avg = sum / count
# ---------------------------------------------------------------------------
def average_monitor(vals: jax.Array, ns: jax.Array) -> jax.Array:
    """vals, ns: (K,) arrays. Returns (4,) f32 = [val_last, sum, count, avg]."""
    vals = vals.astype(jnp.float32)
    ns = ns.astype(jnp.float32)
    total = jnp.sum(vals * ns)
    count = jnp.sum(ns)
    avg = jnp.where(count > 0, total / jnp.maximum(count, 1e-30), 0.0)
    return jnp.stack([vals[-1], total, count, avg])


if __name__ == "__main__":
    key = jax.random.PRNGKey(0)
    k_x, k_v = jax.random.split(key)

    # Small input consistent with an image-model trainer: NCHW = (2, 4, 16, 16)
    x = jax.random.normal(k_x, (2, 4, 16, 16), dtype=jnp.float32)

    # 1) Base-class forward: metadata-level identity (no kernel, no traffic).
    y = model_forward(x)
    assert y is x

    # 2) Materializing identity via the HBM->HBM DMA kernel (forced so the
    #    kernel path is exercised even at this small size).
    y_kernel = identity_materialize(x, force_kernel=True)
    y_kernel = jax.block_until_ready(y_kernel)
    assert y_kernel.shape == x.shape and y_kernel.dtype == x.dtype
    assert bool(jnp.array_equal(y_kernel, x)), "identity kernel mismatch"

    # 2b) Fast path (no kernel) must also be a faithful copy.
    y_fast = jax.block_until_ready(identity_materialize(x))
    assert bool(jnp.array_equal(y_fast, x)), "fast-path identity mismatch"

    # 3) AverageMonitor over 8 simulated per-batch losses with batch_size = 4.
    losses = jax.random.uniform(k_v, (8,), dtype=jnp.float32)
    batch_sizes = jnp.full((8,), 4.0, dtype=jnp.float32)
    stats = jax.block_until_ready(average_monitor(losses, batch_sizes))

    ref_sum = float(jnp.sum(losses * batch_sizes))
    ref_count = float(jnp.sum(batch_sizes))
    ref_avg = ref_sum / ref_count
    assert abs(float(stats[0]) - float(losses[-1])) < 1e-6
    assert abs(float(stats[1]) - ref_sum) < 1e-4
    assert abs(float(stats[2]) - ref_count) < 1e-4
    assert abs(float(stats[3]) - ref_avg) < 1e-5

    print("KERNEL_OK")
</pallas_src>

<mosaic_0001>
module attributes {stable_mosaic.version = 11 : i64} {
  func.func @kernel(%arg0: memref<2x4x16x16xf32, #tpu.memory_space<any>>, %arg1: memref<2x4x16x16xf32, #tpu.memory_space<any>>, %arg2: memref<1x!tpu.dma_semaphore, #tpu.memory_space<semaphore_mem>>) attributes {dimension_semantics = [], scalar_prefetch = 0 : i64, scratch_operands = 1 : i64, tpu.core_type = #tpu.core_type<tc>} {
    %c0_i32 = arith.constant 0 : i32
    %0 = tpu.memref_slice %arg2[%c0_i32] : memref<1x!tpu.dma_semaphore, #tpu.memory_space<semaphore_mem>> -> memref<1x!tpu.dma_semaphore, #tpu.memory_space<semaphore_mem>>
    %1 = tpu.memref_squeeze %0 : memref<1x!tpu.dma_semaphore, #tpu.memory_space<semaphore_mem>> -> memref<!tpu.dma_semaphore, #tpu.memory_space<semaphore_mem>>
    tpu.enqueue_dma source(%arg0 : memref<2x4x16x16xf32, #tpu.memory_space<any>>) target(%arg1 : memref<2x4x16x16xf32, #tpu.memory_space<any>>) target_semaphore(%1 : memref<!tpu.dma_semaphore, #tpu.memory_space<semaphore_mem>>)
    %c0_i32_0 = arith.constant 0 : i32
    %2 = tpu.memref_slice %arg2[%c0_i32_0] : memref<1x!tpu.dma_semaphore, #tpu.memory_space<semaphore_mem>> -> memref<1x!tpu.dma_semaphore, #tpu.memory_space<semaphore_mem>>
    %3 = tpu.memref_squeeze %2 : memref<1x!tpu.dma_semaphore, #tpu.memory_space<semaphore_mem>> -> memref<!tpu.dma_semaphore, #tpu.memory_space<semaphore_mem>>
    tpu.wait_dma2 semaphore(%3 : memref<!tpu.dma_semaphore, #tpu.memory_space<semaphore_mem>>) src(%arg0 : memref<2x4x16x16xf32, #tpu.memory_space<any>>) dst(%arg1 : memref<2x4x16x16xf32, #tpu.memory_space<any>>)
    return
  }
}

</mosaic_0001>

<bundles_post_ra>
// kernel: tpu_custom_call.1
= control target key start
LH: loop header
LB: loop body
LE: loop exit
PB: predicated region body
PF: predicated region fallthrough
CT: control target
= control target key end

     0   :  { %s30_s6 = smov [#allocation2]   ;;  %s31_s7 = smov 131072   ;;  %s49_s0 = inlined_call_operand.hbm [shape: f32[2,4,16,16], index: 0, kind: input, shape index: {}]   ;;  %s50_s1 = inlined_call_operand.hbm [shape: f32[2,4,16,16], index: 1, kind: output, shape index: {}]  }
   0x1   :  { %s32_s8 = smov 0  }
   0x2   :  { %12 = dma.general %s49_s0, 2048, %s50_s1, %s30_s6, %s31_s7, [#allocation4], %s32_s8, 0  }
   0x3   :  { %28 = dma.done.wait [#allocation2], 2048 }
   0x4   :  { %29 = vsyncadd [#allocation2], 4294965248 }
   0x5   :  { %18 = vsyncmov [#allocation2] }
   0x8   :  { %s19_s13 = vpop.sfrf %18 }
   0x9   :  { %p24_p0 = scmp.ne.s32.totalorder %s19_s13, 0 }
   0xb   :  { %23 = shalt.err (%p24_p0)  }

</bundles_post_ra>
